<compile_context>
chip_gen: v6e
topology: v6e:2x2x1
jax: 0.10.0
libtpu: 0.0.40
codegen_flags: <defaults>
</compile_context>

<pallas_src>
import jax
import jax.numpy as jnp
from jax.experimental import pallas as pl
from jax.experimental.pallas import tpu as pltpu


def adapter_kernel(x_ref, w1_ref, b1_ref, w2_ref, b2_ref, o_ref):
    # x_ref: (tm, D) f32   w1_ref: (D, Bp) bf16   b1_ref: (1, Bp) f32
    # w2_ref: (Bp, D) bf16 b2_ref: (1, D) f32     o_ref: (tm, D) f32
    x = x_ref[...]                                   # f32, kept for residual
    x_bf = x.astype(jnp.bfloat16)                    # bf16 MXU operand only

    # Linear 1 (bf16 MXU, f32 accum) + bias + ReLU in f32
    h = jnp.dot(x_bf, w1_ref[...], preferred_element_type=jnp.float32)
    h = jnp.maximum(h + b1_ref[...], 0.0)

    # Linear 2 (bf16 MXU, f32 accum) + bias in f32
    y = jnp.dot(h.astype(jnp.bfloat16), w2_ref[...],
                preferred_element_type=jnp.float32)
    y = y + b2_ref[...]

    # Residual add in f32
    o_ref[...] = (x + y).astype(o_ref.dtype)


def _round_up(a, b):
    return ((a + b - 1) // b) * b


def residual_adapter(x, w1, b1, w2, b2, *, tm=512):
    """x: (N, D) f32; w1: (D, B); b1: (B,); w2: (B, D); b2: (D,)."""
    N, D = x.shape
    B = w1.shape[1]

    # --- pad the bottleneck dim to a full 128-lane multiple (zero pad = no-op) ---
    Bp = max(128, _round_up(B, 128))
    if Bp != B:
        w1 = jnp.pad(w1, ((0, 0), (0, Bp - B)))
        b1 = jnp.pad(b1, (0, Bp - B))
        w2 = jnp.pad(w2, ((0, Bp - B), (0, 0)))

    # weights in bf16 (cast once, resident in VMEM); biases stay f32
    w1_bf = w1.astype(jnp.bfloat16)
    w2_bf = w2.astype(jnp.bfloat16)
    b1_2d = b1.reshape(1, Bp).astype(jnp.float32)
    b2_2d = b2.reshape(1, D).astype(jnp.float32)

    # --- choose the row tile: multiple of 8, <= padded N, and prefer a grid of
    #     length >= 2 so the parallel axis can span both v7x TensorCores ---
    N8 = _round_up(N, 8)
    tm_eff = max(8, (min(tm, N8) // 8) * 8)
    if pl.cdiv(N8, tm_eff) < 2 and N8 >= 16:
        tm_eff = max(8, _round_up(N8 // 2, 8))

    # pad rows so the grid divides evenly; padded rows are garbage, sliced off
    Np = _round_up(N, tm_eff)
    x_p = jnp.pad(x, ((0, Np - N), (0, 0))) if Np != N else x

    grid = (Np // tm_eff,)
    out = pl.pallas_call(
        adapter_kernel,
        out_shape=jax.ShapeDtypeStruct((Np, D), x.dtype),
        grid_spec=pltpu.PrefetchScalarGridSpec(
            num_scalar_prefetch=0,
            grid=grid,
            in_specs=[
                # streamed activations (default double-buffering; bump to
                # pipeline_mode=pl.Buffered(3) only if DMA shows up exposed)
                pl.BlockSpec((tm_eff, D), lambda i: (i, 0)),
                # resident weights / biases (constant index_map -> one DMA)
                pl.BlockSpec((D, Bp), lambda i: (0, 0)),      # W1 (bf16)
                pl.BlockSpec((1, Bp), lambda i: (0, 0)),      # b1 (f32)
                pl.BlockSpec((Bp, D), lambda i: (0, 0)),      # W2 (bf16)
                pl.BlockSpec((1, D), lambda i: (0, 0)),       # b2 (f32)
            ],
            out_specs=pl.BlockSpec((tm_eff, D), lambda i: (i, 0)),
        ),
        compiler_params=pltpu.CompilerParams(
            dimension_semantics=("parallel",)),
    )(x_p, w1_bf, b1_2d, w2_bf, b2_2d)
    return out[:N]


def init_params(key, input_dim, bottleneck_dim):
    """Deterministic init mimicking nn.Linear default (uniform +-1/sqrt(fan_in))."""
    k1, k2, k3, k4 = jax.random.split(key, 4)
    lim1 = 1.0 / (input_dim ** 0.5)
    lim2 = 1.0 / (bottleneck_dim ** 0.5)
    # stored as (in, out) so the kernel computes x @ W  (== x @ W_torch.T)
    w1 = jax.random.uniform(k1, (input_dim, bottleneck_dim), jnp.float32, -lim1, lim1)
    b1 = jax.random.uniform(k2, (bottleneck_dim,), jnp.float32, -lim1, lim1)
    w2 = jax.random.uniform(k3, (bottleneck_dim, input_dim), jnp.float32, -lim2, lim2)
    b2 = jax.random.uniform(k4, (input_dim,), jnp.float32, -lim2, lim2)
    return w1, b1, w2, b2


if __name__ == "__main__":
    key = jax.random.PRNGKey(0)
    batch, seq, input_dim, bottleneck_dim = 2, 8, 128, 64

    kx, kp = jax.random.split(key)
    x = jax.random.normal(kx, (batch, seq, input_dim), jnp.float32)
    w1, b1, w2, b2 = init_params(kp, input_dim, bottleneck_dim)

    # flatten leading dims -> (N, D) for the kernel, reshape back after
    x2d = x.reshape(-1, input_dim)
    out2d = residual_adapter(x2d, w1, b1, w2, b2)
    out = out2d.reshape(batch, seq, input_dim)
    jax.block_until_ready(out)

    # reference check in plain JAX (f32); bf16 MXU operands -> relaxed tolerance
    ref = x + (jnp.maximum(x @ w1 + b1, 0.0) @ w2 + b2)
    assert jnp.allclose(out, ref, atol=2e-2, rtol=2e-2), "mismatch vs reference"

    print("KERNEL_OK")
</pallas_src>

<mosaic_0001>
module attributes {stable_mosaic.version = 11 : i64} {
  func.func @adapter_kernel(%arg0: i32, %arg1: memref<8x128xf32, #tpu.memory_space<vmem>>, %arg2: memref<128x128xbf16, #tpu.memory_space<vmem>>, %arg3: memref<1x128xf32, #tpu.memory_space<vmem>>, %arg4: memref<128x128xbf16, #tpu.memory_space<vmem>>, %arg5: memref<1x128xf32, #tpu.memory_space<vmem>>, %arg6: memref<8x128xf32, #tpu.memory_space<vmem>>) attributes {dimension_semantics = [#tpu.dimension_semantics<parallel>], iteration_bounds = array<i64: 2>, scalar_prefetch = 0 : i64, scratch_operands = 0 : i64, tpu.core_type = #tpu.core_type<tc>, window_params = [{transform_indices = @transform_0, window_bounds = array<i64: 8, 128>}, {pipeline_mode = #tpu.pipeline_mode<synchronous>, transform_indices = @transform_1, window_bounds = array<i64: 128, 128>}, {pipeline_mode = #tpu.pipeline_mode<synchronous>, transform_indices = @transform_2, window_bounds = array<i64: 1, 128>}, {pipeline_mode = #tpu.pipeline_mode<synchronous>, transform_indices = @transform_3, window_bounds = array<i64: 128, 128>}, {pipeline_mode = #tpu.pipeline_mode<synchronous>, transform_indices = @transform_4, window_bounds = array<i64: 1, 128>}, {transform_indices = @transform_5, window_bounds = array<i64: 8, 128>}]} {
    %c0 = arith.constant 0 : index
    %c0_0 = arith.constant 0 : index
    %0 = vector.load %arg1[%c0, %c0_0] : memref<8x128xf32, #tpu.memory_space<vmem>>, vector<8x128xf32>
    %1 = arith.truncf %0 : vector<8x128xf32> to vector<8x128xbf16>
    %c0_1 = arith.constant 0 : index
    %c0_2 = arith.constant 0 : index
    %2 = vector.load %arg2[%c0_1, %c0_2] : memref<128x128xbf16, #tpu.memory_space<vmem>>, vector<128x128xbf16>
    %cst = arith.constant dense<0.000000e+00> : vector<8x128xf32>
    %3 = tpu.matmul %1, %2, %cst {dimension_numbers = #tpu.dot_dimension_numbers<[1], [0], [0], [1], [0, 0, 1, 1], [], []>} : vector<8x128xbf16>, vector<128x128xbf16>, vector<8x128xf32> -> vector<8x128xf32>
    %c0_3 = arith.constant 0 : index
    %c0_4 = arith.constant 0 : index
    %4 = vector.load %arg3[%c0_3, %c0_4] : memref<1x128xf32, #tpu.memory_space<vmem>>, vector<1x128xf32>
    %5 = vector.broadcast %4 : vector<1x128xf32> to vector<8x128xf32>
    %6 = arith.addf %3, %5 : vector<8x128xf32>
    %cst_5 = arith.constant 0.000000e+00 : f32
    %7 = vector.broadcast %cst_5 : f32 to vector<8x128xf32>
    %8 = arith.maximumf %6, %7 : vector<8x128xf32>
    %9 = arith.truncf %8 : vector<8x128xf32> to vector<8x128xbf16>
    %c0_6 = arith.constant 0 : index
    %c0_7 = arith.constant 0 : index
    %10 = vector.load %arg4[%c0_6, %c0_7] : memref<128x128xbf16, #tpu.memory_space<vmem>>, vector<128x128xbf16>
    %cst_8 = arith.constant dense<0.000000e+00> : vector<8x128xf32>
    %11 = tpu.matmul %9, %10, %cst_8 {dimension_numbers = #tpu.dot_dimension_numbers<[1], [0], [0], [1], [0, 0, 1, 1], [], []>} : vector<8x128xbf16>, vector<128x128xbf16>, vector<8x128xf32> -> vector<8x128xf32>
    %c0_9 = arith.constant 0 : index
    %c0_10 = arith.constant 0 : index
    %12 = vector.load %arg5[%c0_9, %c0_10] : memref<1x128xf32, #tpu.memory_space<vmem>>, vector<1x128xf32>
    %13 = vector.broadcast %12 : vector<1x128xf32> to vector<8x128xf32>
    %14 = arith.addf %11, %13 : vector<8x128xf32>
    %15 = arith.addf %0, %14 : vector<8x128xf32>
    %c0_11 = arith.constant 0 : index
    %c0_12 = arith.constant 0 : index
    %16 = vector.load %arg6[%c0_11, %c0_12] : memref<8x128xf32, #tpu.memory_space<vmem>>, vector<8x128xf32>
    tpu.vector_store %arg6[%c0_11, %c0_12], %15 {strides = array<i32>} : memref<8x128xf32, #tpu.memory_space<vmem>>, vector<8x128xf32>,
    return
  }
  func.func @transform_0(%arg0: i32) -> (i32, i32) {
    %c0_i32 = arith.constant 0 : i32
    %c0_i32_0 = arith.constant 0 : i32
    return %arg0, %c0_i32 : i32, i32
  }
  func.func @transform_1(%arg0: i32) -> (i32, i32) {
    %c0_i32 = arith.constant 0 : i32
    %c0_i32_0 = arith.constant 0 : i32
    %c0_i32_1 = arith.constant 0 : i32
    return %c0_i32, %c0_i32_0 : i32, i32
  }
  func.func @transform_2(%arg0: i32) -> (i32, i32) {
    %c0_i32 = arith.constant 0 : i32
    %c0_i32_0 = arith.constant 0 : i32
    %c0_i32_1 = arith.constant 0 : i32
    return %c0_i32, %c0_i32_0 : i32, i32
  }
  func.func @transform_3(%arg0: i32) -> (i32, i32) {
    %c0_i32 = arith.constant 0 : i32
    %c0_i32_0 = arith.constant 0 : i32
    %c0_i32_1 = arith.constant 0 : i32
    return %c0_i32, %c0_i32_0 : i32, i32
  }
  func.func @transform_4(%arg0: i32) -> (i32, i32) {
    %c0_i32 = arith.constant 0 : i32
    %c0_i32_0 = arith.constant 0 : i32
    %c0_i32_1 = arith.constant 0 : i32
    return %c0_i32, %c0_i32_0 : i32, i32
  }
  func.func @transform_5(%arg0: i32) -> (i32, i32) {
    %c0_i32 = arith.constant 0 : i32
    %c0_i32_0 = arith.constant 0 : i32
    return %arg0, %c0_i32 : i32, i32
  }
}

</mosaic_0001>

<bundles_post_ra>
// kernel: tpu_custom_call.1
= control target key start
LH: loop header
LB: loop body
LE: loop exit
PB: predicated region body
PF: predicated region fallthrough
CT: control target
= control target key end

     0   :  { %10 = vsyncpa [#allocation3], 0  ;;  %s1158_s0 = inlined_call_operand.hbm [shape: f32[16,128], index: 0, kind: input, shape index: {}]   ;;  %s1159_s1 = inlined_call_operand.hbm [shape: bf16[128,128], index: 1, kind: input, shape index: {}]   ;;  %s1160_s2 = inlined_call_operand.vmem [shape: f32[1,128], index: 2, kind: input, shape index: {}]   ;;  %s1161_s3 = inlined_call_operand.hbm [shape: bf16[128,128], index: 3, kind: input, shape index: {}]   ;;  %s1162_s4 = inlined_call_operand.vmem [shape: f32[1,128], index: 4, kind: input, shape index: {}]   ;;  %s1163_s5 = inlined_call_operand.hbm [shape: f32[16,128], index: 5, kind: output, shape index: {}]  }
   0x1   :  { %12 = vsyncpa [#allocation3 + $0x1], 0 }
   0x2   :  { %13 = vsyncpa [#allocation6], 0 }
   0x3   :  { %14 = vsyncpa [#allocation4], 0 }
   0x4   :  { %16 = vsyncpa [#allocation4 + $0x1], 0  ;;  %s968_s18 = smov 0   ;;  %s970_s19 = smov 0  }
   0x5   :  { %s972_s20 = smov 0   ;;  %s974_s21 = smov 0  }
   0x6 LB: > { %s989_s22 = sadd.s32 4294967295, %s928_s21   ;;  %s601_s23 = sadd.s32 4294967294, %s928_s21   ;;  %s928_s21 = sphi %s974_s21, %s1185_s21   ;;  %s924_s20 = sphi %s972_s20, %s1184_s20   ;;  %s920_s19 = sphi %s970_s19, %s1183_s19   ;;  %s916_s18 = sphi %s968_s18, %s1182_s18  }
   0x7   : > { %p42_p0 = scmp.ne.s32.totalorder %s920_s19, %s916_s18  ;;  %p1164_p1 = scmp.eq.s32.totalorder %s989_s22, 0 }
   0x8   : > { %p156_p3 = scmp.eq.s32.totalorder %s601_s23, 1  ;;  %p602_p5 = scmp.ge.s32.totalorder %s928_s21, 1 }
   0x9   : > { %p998_p4 = por %p1164_p1, %p42_p0  ;;  %p163_p7 = scmp.lt.s32.totalorder %s928_s21, 3 }
   0xa   : > { %p1003_p6 = por %p156_p3, %p42_p0  ;;  %s930_s27 = smov [#allocation5]  }
   0xb   : > { %s1168_s24 = scalar_select %p998_p4, 1, 0 }
   0xc   : > { %s1169_s25 = scalar_select %p1003_p6, 1, 0 }
   0xd   : > { %p1008_p8 = pnand %p602_p5, %p163_p7  ;;  %s175_s28 = sshll.u32 %s930_s27, 4  ;;  %s176_s28 = int_to_ptr.vmem [resolvable:$true] %s175_s28 }
   0xe   : > { %s931_s30 = smov [#allocation7]   ;;  %s791_s7 = scalar_lea.vmem %s176_s28, 1024 }
   0xf   : > { %s1170_s26 = scalar_select %p1008_p8, 1, 0 }
  0x10   : > { %p705_p9 = pneg %p1008_p8  ;;  %s191_s6 = sshll.u32 %s931_s30, 4  ;;  %s192_s6 = int_to_ptr.vmem [resolvable:$true] %s191_s6 }
  0x11   : > { %p792_p13 = scmp.ne.s32.totalorder %s176_s28, %s791_s7  ;;  %p799_p5 = scmp.lt.s32.totalorder %s176_s28, %s176_s28 }
  0x12   : > { %p1017_p11 = pnand %p705_p9, %p1164_p1  ;;  %p800_p7 = scmp.lt.s32.totalorder %s791_s7, %s791_s7 }
  0x14   : > { %p782_p12 = pneg %p1017_p11  ;;  %p801_p10 = por %p800_p7, %p799_p5 }
  0x16   : > { %p794_p0 = pnand %p792_p13, %p782_p12 }
  0x18   : > { %p795_p3 = pneg %p794_p0 }
  0x1a   : > { %p802_p9 = pnand %p801_p10, %p795_p3 }
  0x1c   : > { %805 = shalt.err (!%p802_p9)
}
  0x1d   : > { %s932_s8 = smov 64   ;;  %s933_s9 = smov 4  }
  0x1e   : > { %708 = dma.hbm_to_vmem [thread:$0]  (!%p1017_p11), %s1159_s1, 1024, %s176_s28, [#allocation6], %s932_s8, %s932_s8, %s933_s9  }
  0x1f   : > { %s817_s12 = scalar_lea.vmem %s192_s6, 1024  ;;  %p825_p2 = scmp.lt.s32.totalorder %s192_s6, %s192_s6 }
  0x20   : > { %p818_p1 = scmp.ne.s32.totalorder %s192_s6, %s817_s12  ;;  %p826_p6 = scmp.lt.s32.totalorder %s817_s12, %s817_s12 }
  0x22   : > { %p820_p13 = pnand %p818_p1, %p782_p12  ;;  %p827_p5 = por %p826_p6, %p825_p2 }
  0x24   : > { %p821_p0 = pneg %p820_p13 }
  0x26   : > { %p828_p10 = pnand %p827_p5, %p821_p0 }
  0x28   : > { %831 = shalt.err (!%p828_p10)
}
  0x29   : > { %711 = dma.hbm_to_vmem [thread:$0]  (!%p1017_p11), %s1161_s3, 1024, %s192_s6, [#allocation6], %s932_s8, %s932_s8, %s933_s9  }
  0x2a   : > { %s1040_s15 = sadd.s32 1, %s928_s21   ;;  %s29_s16 = sadd.s32 1, %s924_s20 }
  0x2b   : > { %s26_s17 = ssub.s32 %s928_s21, %s1040_s15  ;;  %p36_p1 = scmp.ne.s32.totalorder %s924_s20, %s920_s19 }
  0x2c   : > { %p27_p2 = scmp.eq.s32.totalorder %s26_s17, 0  ;;  %p37_p6 = scmp.eq.s32.totalorder %s928_s21, 0 }
  0x2d   : > { %p1172_p12 = scmp.eq.s32.totalorder %s989_s22, 1  ;;  %p722_p7 = scmp.lt.s32.totalorder %s928_s21, 2 }
  0x2e   : > { %s1056_s27 = scalar_select %p27_p2, %s924_s20, %s29_s16  }
  0x2f   : > { %p1050_p3 = por %p1172_p12, %p36_p1  ;;  %p38_p9 = por %p37_p6, %p36_p1 }
  0x30   : > { %s208_s28 = sand.u32 1, %s924_s20   ;;  %s607_s30 = sshll.u32 %s928_s21, 7 }
  0x31   : > { %s1173_s23 = scalar_select %p1050_p3, 1, 0 }
  0x32   : > { %s606_s29 = sshll.u32 %s208_s28, 3  ;;  %s1063_s8 = scalar_lea.hbm %s1158_s0, %s607_s30 }
  0x33   : > { %s212_s9 = scalar_lea.vmem [#allocation2], %s606_s29  ;;  %p1065_p11 = pnand %p722_p7, %p38_p9 }
  0x34   : > { %s219_s10 = sshll.u32 %s212_s9, 4  ;;  %s209_s12 = scalar_lea.sflag [#allocation3], %s208_s28  ;;  %s220_s10 = int_to_ptr.vmem [resolvable:$true] %s219_s10 }
  0x35   : > { %s832_s13 = scalar_lea.hbm %s1063_s8, 128  ;;  %p834_p0 = pneg %p1065_p11 }
  0x36   : > { %p833_p13 = scmp.ne.s32.totalorder %s1063_s8, %s832_s13  ;;  %s837_s17 = scalar_lea.hbm %s1158_s0, 256 }
  0x37   : > { %p838_p1 = scmp.lt.s32.totalorder %s1063_s8, %s1158_s0  ;;  %p839_p2 = scmp.lt.s32.totalorder %s837_s17, %s832_s13 }
  0x38   : > { %p835_p5 = pnand %p834_p0, %p833_p13 }
  0x39   : > { %p840_p6 = por %p839_p2, %p838_p1 }
  0x3a   : > { %p836_p10 = pneg %p835_p5 }
  0x3c   : > { %p841_p12 = pnand %p840_p6, %p836_p10 }
  0x3e   : > { %844 = shalt.err (!%p841_p12)
}
  0x3f   : > { %s845_s6 = scalar_lea.vmem %s220_s10, 128  ;;  %s934_s28 = smov [#allocation2]  }
  0x40   : > { %p846_p7 = scmp.ne.s32.totalorder %s220_s10, %s845_s6  ;;  %s850_s7 = sshll.u32 %s934_s28, 4  ;;  %s851_s7 = int_to_ptr.vmem [resolvable:$false] %s850_s7 }
  0x41   : > { %s852_s9 = scalar_lea.vmem %s851_s7, 256  ;;  %p853_p13 = scmp.lt.s32.totalorder %s220_s10, %s851_s7 }
  0x42   : > { %p848_p9 = pnand %p846_p7, %p834_p0  ;;  %p854_p5 = scmp.lt.s32.totalorder %s852_s9, %s845_s6 }
  0x44   : > { %p849_p3 = pneg %p848_p9  ;;  %p855_p4 = por %p854_p5, %p853_p13 }
  0x46   : > { %p856_p8 = pnand %p855_p4, %p849_p3 }
  0x48   : > { %859 = shalt.err (!%p856_p8)
}
  0x49   : > { %715 = dma.hbm_to_vmem [thread:$0]  (!%p1065_p11), %s1063_s8, 128, %s220_s10, %s209_s12  }
  0x4a   : > { %p1175_p10 = scmp.ne.s32.totalorder %s1170_s26, 0 }
  0x4b   : > { %s1086_s13 = sand.u32 (!%p1175_p10), 1, %s920_s19   ;;  %p1176_p4 = scmp.ne.s32.totalorder (!%p1175_p10), %s1168_s24, 0 }
  0x4c   : > { %228 = sbr.rel (%p1175_p10) target bundleno = 529 (0x211), region = 40  ;;  %s609_s14 = sshll.u32 (!%p1175_p10), %s1086_s13, 3 }
  0x4d   : > { %s231_s16 = scalar_lea.sflag (!%p1175_p10), [#allocation3], %s1086_s13  ;;  %s1092_s17 = scalar_lea.vmem (!%p1175_p10), [#allocation2], %s609_s14 }
  0x51   : > { %903 = dma.done.wait (%p1176_p4), %s231_s16, 128  }
  0x52   : > { %905 = vsyncadd (%p1176_p4), %s231_s16, 4294967168  ;;  %p1177_p8 = scmp.eq.s32.totalorder %s989_s22, 0 }
  0x54   : > { %907 = dma.done.wait (%p1177_p8), [#allocation6], 2048   ;;  %p1178_p3 = pmov %p1177_p8 }
  0x55   : > { %v935_v0 = vmov 0.0   ;;  %vm936_vm0 = vmmov 0   ;;  %v764_v1 = vld [vmem:[#allocation5 + $0x38] sm:$0xff]   ;;  %v765_v2 = vld [vmem:[#allocation5 + $0x30] sm:$0xff]   ;;  %v766_v3 = vld [vmem:[#allocation5 + $0x28] sm:$0xff]   ;;  %s632_s11 = sshll.u32 %s989_s22, 7 }
  0x56   : > { %909 = vsyncadd (%p1178_p3), [#allocation6], 4294965248  ;;  %653 = vmatprep.subr.bf16.mxu0 %v935_v0  ;;  %669 = vmatprep.mubr.msk.bf16.mxu0 %vm936_vm0, %v935_v0  ;;  %v772_v4 = vld [vmem:[#allocation7 + $0x38] sm:$0xff]   ;;  %v767_v5 = vld [vmem:[#allocation5 + $0x20] sm:$0xff]   ;;  %s268_s12 = scalar_lea.vmem [#allocation8], %s609_s14  ;;  %s1115_s28 = scalar_lea.hbm %s1163_s5, %s632_s11 }
  0x57   : > { %673 = vmatprep.subr.bf16.mxu1 %v935_v0  ;;  %689 = vmatprep.mubr.msk.bf16.mxu1 %vm936_vm0, %v935_v0  ;;  %v773_v6 = vld [vmem:[#allocation7 + $0x30] sm:$0xff]   ;;  %v768_v7 = vld [vmem:[#allocation5 + $0x18] sm:$0xff]   ;;  %v774_v8 = vld [vmem:[#allocation7 + $0x28] sm:$0xff]   ;;  %s512_s30 = sshll.u32 %s268_s12, 4  ;;  %s499_s22 = scalar_lea.sflag [#allocation4], %s1086_s13  ;;  %s1117_s30 = int_to_ptr.vmem [resolvable:$true] %s512_s30 }
  0x58   : > { %654 = vmatpush3.bf16.msra.mxu0 %v764_v1  ;;  %674 = vmatpush3.bf16.msra.mxu1 %v772_v4  ;;  %v769_v9 = vld [vmem:[#allocation5 + $0x10] sm:$0xff]   ;;  %v775_v10 = vld [vmem:[#allocation7 + $0x20] sm:$0xff]   ;;  %v770_v11 = vld [vmem:[#allocation5 + $0x8] sm:$0xff]   ;;  %s860_s7 = scalar_lea.vmem %s1117_s30, 128  ;;  %p1179_p0 = scmp.ne.s32.totalorder %s1173_s23, 0 }
  0x59   : > { %655 = vmatprep.subr.bf16.mxu0 %v935_v0  ;;  %675 = vmatprep.subr.bf16.mxu1 %v935_v0  ;;  %v776_v12 = vld [vmem:[#allocation7 + $0x18] sm:$0xff]   ;;  %v771_v13 = vld [vmem:[#allocation5] sm:$0xff]   ;;  %v777_v15 = vld [vmem:[#allocation7 + $0x10] sm:$0xff]   ;;  %p861_p11 = scmp.ne.s32.totalorder %s1117_s30, %s860_s7  ;;  %s937_s9 = smov [#allocation8]  }
  0x5a   : > { %v270_v14 = vld [vmem:[%s1092_s17] sm:$0xff]  ;;  %v778_v17 = vld [vmem:[#allocation7 + $0x8] sm:$0xff]   ;;  %v779_v18 = vld [vmem:[#allocation7] sm:$0xff]   ;;  %s864_s14 = sshll.u32 %s937_s9, 4  ;;  %s865_s14 = int_to_ptr.vmem [resolvable:$false] %s864_s14 }
  0x5b   : > { %v271_v16 = vpack.c.bf16 %v270_v14, %v270_v14  ;;  %v613_v19 = vld [vmem:[%s1160_s2] ss:$0 sm:$0xff]  ;;  %p862_p1 = pnand %p861_p11, %p1179_p0  ;;  %s866_s16 = scalar_lea.vmem %s865_s14, 256 }
  0x5c   : > { %656 = vmatpush3.bf16.msra.mxu0 %v765_v2  ;;  %676 = vmatpush3.bf16.msra.mxu1 %v773_v6  ;;  %v622_v27 = vld [vmem:[%s1162_s4] ss:$0 sm:$0xff]  ;;  %p867_p6 = scmp.lt.s32.totalorder %s1117_s30, %s865_s14  ;;  %p868_p12 = scmp.lt.s32.totalorder %s866_s16, %s860_s7 }
  0x5d   : > { %657 = vmatprep.subr.bf16.mxu0 %v935_v0  ;;  %677 = vmatprep.subr.bf16.mxu1 %v935_v0  ;;  %p863_p2 = pneg %p862_p1 }
  0x5e   : > { %p869_p7 = por %p868_p12, %p867_p6 }
  0x60   : > { %658 = vmatpush3.bf16.msra.mxu0 %v766_v3  ;;  %678 = vmatpush3.bf16.msra.mxu1 %v774_v8  ;;  %p870_p9 = pnand %p869_p7, %p863_p2 }
  0x61   : > { %659 = vmatprep.subr.bf16.mxu0 %v935_v0  ;;  %679 = vmatprep.subr.bf16.mxu1 %v935_v0 }
  0x64   : > { %660 = vmatpush3.bf16.msra.mxu0 %v767_v5  ;;  %680 = vmatpush3.bf16.msra.mxu1 %v775_v10 }
  0x65   : > { %661 = vmatprep.subr.bf16.mxu0 %v935_v0  ;;  %681 = vmatprep.subr.bf16.mxu1 %v935_v0 }
  0x68   : > { %662 = vmatpush3.bf16.msra.mxu0 %v768_v7  ;;  %682 = vmatpush3.bf16.msra.mxu1 %v776_v12 }
  0x69   : > { %663 = vmatprep.subr.bf16.mxu0 %v935_v0  ;;  %683 = vmatprep.subr.bf16.mxu1 %v935_v0 }
  0x6c   : > { %664 = vmatpush3.bf16.msra.mxu0 %v769_v9  ;;  %684 = vmatpush3.bf16.msra.mxu1 %v777_v15 }
  0x6d   : > { %665 = vmatprep.subr.bf16.mxu0 %v935_v0  ;;  %685 = vmatprep.subr.bf16.mxu1 %v935_v0 }
  0x70   : > { %666 = vmatpush3.bf16.msra.mxu0 %v770_v11  ;;  %686 = vmatpush3.bf16.msra.mxu1 %v778_v17 }
  0x71   : > { %667 = vmatprep.subr.bf16.mxu0 %v935_v0  ;;  %687 = vmatprep.subr.bf16.mxu1 %v935_v0 }
  0x74   : > { %668 = vmatpush3.bf16.msra.mxu0 %v771_v13  ;;  %688 = vmatpush3.bf16.msra.mxu1 %v779_v18 }
  0x77   : > { %670 = vmatmul.mubr.bf16.vlgmr.msra.gmra.mxu0 %v271_v16 }
 0x137   : > { %v377_v20 = vpop.f32.mrf.mxu0 }
 0x138   : > { %v378_v21 = vadd.f32 %v613_v19, %v377_v20 }
 0x139   : > { %v671_v22 = vpop.f32.mrf.mxu0 }
 0x13a   : > { %v383_v23 = vmax.f32 %v378_v21, 0.0 }
 0x13b   : > { %v380_v24 = vpop.f32.mrf.mxu0 }
 0x13c   : > { %v384_v25 = vpack.c.bf16 %v383_v23, %v383_v23 }
 0x13d   : > { %v672_v26 = vpop.f32.mrf.mxu0 }
 0x13e   : > { %690 = vmatmul.mubr.bf16.vlgmr.msra.gmra.mxu1 %v384_v25 }
 0x1fe   : > { %v490_v28 = vpop.f32.mrf.mxu1 }
 0x1ff   : > { %v491_v29 = vadd.f32 %v622_v27, %v490_v28 }
 0x200   : > { %v691_v30 = vpop.f32.mrf.mxu1 }
 0x201   : > { %v496_v31 = vadd.f32 %v491_v29, %v270_v14 }
 0x202   : > { %v493_v32 = vpop.f32.mrf.mxu1 }
 0x203   : > { %497 = vst [vmem:[%s268_s12] sm:$0xff] %v496_v31 }
 0x204   : > { %v692_v33 = vpop.f32.mrf.mxu1 }
 0x205   : > { %873 = shalt.err (!%p870_p9)
}
 0x206   : > { %s874_s17 = scalar_lea.hbm %s1115_s28, 128  ;;  %s878_s26 = scalar_lea.hbm %s1163_s5, 256 }
 0x207   : > { %p875_p13 = scmp.ne.s32.totalorder %s1115_s28, %s874_s17  ;;  %p879_p4 = scmp.lt.s32.totalorder %s1115_s28, %s1163_s5 }
 0x208   : > { %p880_p8 = scmp.lt.s32.totalorder %s878_s26, %s874_s17 }
 0x209   : > { %p876_p5 = pnand %p875_p13, %p1179_p0 }
 0x20a   : > { %p881_p3 = por %p880_p8, %p879_p4 }
 0x20b   : > { %p877_p10 = pneg %p876_p5 }
 0x20d   : > { %p882_p11 = pnand %p881_p3, %p877_p10 }
 0x20f   : > { %885 = shalt.err (!%p882_p11)
}
 0x210   : > { %703 = dma.vmem_to_hbm [thread:$0]  (%p1179_p0), %s1117_s30, 128, %s1115_s28, %s499_s22  }
 0x211 PF: > { %s524_s11 = sand.u32 1, %s916_s18   ;;  %p1180_p1 = scmp.ne.s32.totalorder %s1169_s25, 0 }
 0x212   : > { %p1181_p2 = scmp.ge.s32.totalorder %s928_s21, 2  ;;  %s525_s12 = scalar_lea.sflag [#allocation4], %s524_s11 }
 0x214   : > { %p717_p6 = pnand %p1181_p2, %p1180_p1 }
 0x216   : > { %p718_p12 = pneg %p717_p6 }
 0x218   : > { %911 = dma.done.wait (%p718_p12), %s525_s12, 128  }
 0x219   : > { %913 = vsyncadd (%p718_p12), %s525_s12, 4294967168  ;;  %p19_p7 = scmp.ge.s32.totalorder %s1040_s15, 4   ;;  %s1182_s18 = smov %s920_s19 }
 0x21a   : > { %s1183_s19 = smov %s924_s20  ;;  %s1184_s20 = smov %s1056_s27 }
 0x21b   : > { %s1185_s21 = smov %s1040_s15  ;;  %21 = sbr.rel (!%p19_p7) target bundleno = 6 (0x6), region = 93 }
 0x220   :  { %530 = vsyncpa [#allocation3], 1 }
 0x221   :  { %532 = vsyncpa [#allocation3 + $0x1], 1 }
 0x222   :  { %533 = vsyncpa [#allocation6], 1 }
 0x223   :  { %534 = vsyncpa [#allocation4], 1 }
 0x224   :  { %536 = vsyncpa [#allocation4 + $0x1], 1 }

</bundles_post_ra>
